<compile_context>
chip_gen: v6e
topology: v6e:2x2x1
jax: 0.10.0
libtpu: 0.0.40
codegen_flags: <defaults>
</compile_context>

<pallas_src>
import jax
import jax.numpy as jnp
from jax.experimental import pallas as pl
from jax.experimental.pallas import tpu as pltpu


def _outconv_mxu_kernel(x_ref, w_ref, b_ref, o_ref):
    """MXU path (C_in >= 16): out = W @ x + b, contraction on the systolic array.

    x_ref: (1, C_in, TM)   pixels on lanes, channels on sublanes
    w_ref: (C_out, C_in)   VMEM-resident (constant index_map)
    b_ref: (C_out, 1)      VMEM-resident
    o_ref: (1, C_out, TM)  lane-dense output
    """
    x = x_ref[0]                                   # (C_in, TM)
    w = w_ref[...].astype(x.dtype)                 # match dtypes for the MXU
    acc = jnp.dot(w, x, preferred_element_type=jnp.float32)   # (C_out, TM), f32
    o_ref[0] = (acc + b_ref[...].astype(jnp.float32)).astype(o_ref.dtype)


def _outconv_vpu_kernel(x_ref, w_ref, b_ref, o_ref):
    """VPU fallback (tiny C_in): unrolled multiply-add chain, f32 accumulation,
    bias folded into the accumulator init."""
    c_in = x_ref.shape[1]
    x = x_ref[0].astype(jnp.float32)               # (C_in, TM)
    w = w_ref[...].astype(jnp.float32)             # (C_out, C_in)
    b = b_ref[...].astype(jnp.float32)             # (C_out, 1)

    acc = w[:, 0:1] * x[0:1, :] + b                # bias folded into init
    for ci in range(1, c_in):
        acc = acc + w[:, ci:ci + 1] * x[ci:ci + 1, :]

    o_ref[0] = acc.astype(o_ref.dtype)


def _pick_tm(hw, n, c_in, c_out, itemsize, tile_m, vmem_budget_bytes):
    """Pixel-axis tile size: as large as possible (amortize the ~0.35 us/step
    grid overhead), lane/sublane-dense (multiple of 1024 when HW > 1024),
    VMEM-budgeted (v7x-safe), but with enough grid steps to keep the pipeline
    busy and feed both TensorCores on v7x."""
    if hw <= 1024:
        return hw                                   # whole axis in one block
    # Double-buffered input + output tiles must fit the VMEM budget.
    bytes_per_pixel = 2 * (c_in + c_out) * itemsize
    vmem_cap = max(1024, vmem_budget_bytes // bytes_per_pixel)
    tm = min(tile_m, hw, vmem_cap)
    tm = max(1024, (tm // 1024) * 1024)             # lane/sublane-dense tiles
    min_steps = 8
    while tm > 1024 and n * pl.cdiv(hw, tm) < min_steps:
        tm = max(1024, ((tm // 2) // 1024) * 1024)
    return tm


def out_conv(x_nchw, weight, bias, *, tile_m=32768,
             vmem_budget_bytes=24 * 1024 * 1024):
    """1x1 Conv2d forward (OutConv).

    x_nchw: (N, C_in, H, W)
    weight: (C_out, C_in) or (C_out, C_in, 1, 1)
    bias:   (C_out,)
    returns (N, C_out, H, W)
    """
    N, C_in, H, W = x_nchw.shape
    C_out = weight.shape[0]
    HW = H * W

    # Channel-major: free reshapes only, no HBM transposes.
    x3 = x_nchw.reshape(N, C_in, HW)
    w2 = weight.reshape(C_out, -1)
    b2 = bias.reshape(C_out, 1)

    TM = _pick_tm(HW, N, C_in, C_out, x_nchw.dtype.itemsize, tile_m,
                  vmem_budget_bytes)
    grid = (N, pl.cdiv(HW, TM))

    # Realistic channel counts go to the MXU (empties the VALU slots); tiny
    # channel counts keep the known-good unrolled VPU chain.
    kernel = _outconv_mxu_kernel if C_in >= 16 else _outconv_vpu_kernel

    out3 = pl.pallas_call(
        kernel,
        out_shape=jax.ShapeDtypeStruct((N, C_out, HW), x_nchw.dtype),
        grid=grid,
        in_specs=[
            pl.BlockSpec((1, C_in, TM), lambda n, m: (n, 0, m)),
            pl.BlockSpec((C_out, C_in), lambda n, m: (0, 0)),   # resident
            pl.BlockSpec((C_out, 1), lambda n, m: (0, 0)),      # resident
        ],
        out_specs=pl.BlockSpec((1, C_out, TM), lambda n, m: (n, 0, m)),
        compiler_params=pltpu.CompilerParams(
            dimension_semantics=("parallel", "parallel"),
            # 32 MiB scoped VMEM is safe on v5e/v6e/v7x (v7x has only 64 MiB
            # physical VMEM — do not raise this toward 64 MiB).
            vmem_limit_bytes=32 * 1024 * 1024,
        ),
    )(x3, w2, b2)

    return out3.reshape(N, C_out, H, W)


def _reference(x, weight, bias):
    w2 = weight.reshape(weight.shape[0], -1).astype(jnp.float32)
    out = jnp.einsum("nchw,oc->nohw", x.astype(jnp.float32), w2,
                     precision=jax.lax.Precision.HIGHEST)
    return (out + bias.astype(jnp.float32)[None, :, None, None]).astype(x.dtype)


def _make_case(kx, kw, kb, n, c_in, c_out, h, w):
    x = jax.random.normal(kx, (n, c_in, h, w), dtype=jnp.float32)
    # PyTorch Conv2d default init: uniform(-1/sqrt(fan_in), 1/sqrt(fan_in)).
    bound = 1.0 / (c_in ** 0.5)
    weight = jax.random.uniform(kw, (c_out, c_in), minval=-bound, maxval=bound,
                                dtype=jnp.float32)
    bias = jax.random.uniform(kb, (c_out,), minval=-bound, maxval=bound,
                              dtype=jnp.float32)
    return x, weight, bias


if __name__ == "__main__":
    key = jax.random.PRNGKey(0)
    ks = jax.random.split(key, 9)

    # --- Test 1: tiny head shapes (VPU fallback, whole-axis single block) ---
    x, w, b = _make_case(ks[0], ks[1], ks[2], 2, 4, 3, 16, 16)
    out = jax.block_until_ready(out_conv(x, w, b))
    ref = _reference(x, w, b)
    assert out.shape == (2, 3, 16, 16)
    assert jnp.allclose(out, ref, atol=1e-5, rtol=1e-5)

    # --- Test 2: VPU fallback, multi-tile grid with a partial last tile -----
    # HW = 1600 -> TM = 1024, grid_m = 2 with a 576-pixel rump tile.
    x, w, b = _make_case(ks[3], ks[4], ks[5], 1, 6, 2, 40, 40)
    out = jax.block_until_ready(out_conv(x, w, b))
    ref = _reference(x, w, b)
    assert out.shape == (1, 2, 40, 40)
    assert jnp.allclose(out, ref, atol=1e-5, rtol=1e-5)

    # --- Test 3: realistic OutConv channels (C_in = hidden_size = 64) -------
    # MXU path, multi-tile grid with rump tile (HW = 1600 -> TM = 1024).
    x, w, b = _make_case(ks[6], ks[7], ks[8], 2, 64, 3, 40, 40)
    out = jax.block_until_ready(out_conv(x, w, b))
    ref = _reference(x, w, b)
    assert out.shape == (2, 3, 40, 40)
    assert jnp.allclose(out, ref, atol=5e-3, rtol=1e-3)

    print("KERNEL_OK")
</pallas_src>

<mosaic_0001>
module attributes {stable_mosaic.version = 11 : i64} {
  func.func @_outconv_vpu_kernel(%arg0: i32, %arg1: i32, %arg2: memref<1x4x256xf32, #tpu.memory_space<vmem>>, %arg3: memref<3x4xf32, #tpu.memory_space<vmem>>, %arg4: memref<3x1xf32, #tpu.memory_space<vmem>>, %arg5: memref<1x3x256xf32, #tpu.memory_space<vmem>>) attributes {dimension_semantics = [#tpu.dimension_semantics<parallel>, #tpu.dimension_semantics<parallel>], iteration_bounds = array<i64: 2, 1>, scalar_prefetch = 0 : i64, scratch_operands = 0 : i64, tpu.core_type = #tpu.core_type<tc>, window_params = [{transform_indices = @transform_0, window_bounds = array<i64: 1, 4, 256>}, {pipeline_mode = #tpu.pipeline_mode<synchronous>, transform_indices = @transform_1, window_bounds = array<i64: 3, 4>}, {pipeline_mode = #tpu.pipeline_mode<synchronous>, transform_indices = @transform_2, window_bounds = array<i64: 3, 1>}, {transform_indices = @transform_3, window_bounds = array<i64: 1, 3, 256>}]} {
    %c0 = arith.constant 0 : index
    %c0_0 = arith.constant 0 : index
    %c0_1 = arith.constant 0 : index
    %0 = vector.load %arg2[%c0, %c0_0, %c0_1] : memref<1x4x256xf32, #tpu.memory_space<vmem>>, vector<1x4x256xf32>
    %1 = vector.shape_cast %0 : vector<1x4x256xf32> to vector<4x256xf32>
    %c0_2 = arith.constant 0 : index
    %c0_3 = arith.constant 0 : index
    %2 = vector.load %arg3[%c0_2, %c0_3] : memref<3x4xf32, #tpu.memory_space<vmem>>, vector<3x4xf32>
    %c0_4 = arith.constant 0 : index
    %c0_5 = arith.constant 0 : index
    %3 = vector.load %arg4[%c0_4, %c0_5] : memref<3x1xf32, #tpu.memory_space<vmem>>, vector<3x1xf32>
    %4 = vector.extract_strided_slice %2 {offsets = [0, 0], sizes = [3, 1], strides = [1, 1]} : vector<3x4xf32> to vector<3x1xf32>
    %5 = vector.extract_strided_slice %1 {offsets = [0, 0], sizes = [1, 256], strides = [1, 1]} : vector<4x256xf32> to vector<1x256xf32>
    %6 = vector.broadcast %4 : vector<3x1xf32> to vector<3x256xf32>
    %7 = vector.broadcast %5 : vector<1x256xf32> to vector<3x256xf32>
    %8 = arith.mulf %6, %7 : vector<3x256xf32>
    %9 = vector.broadcast %3 : vector<3x1xf32> to vector<3x256xf32>
    %10 = arith.addf %8, %9 : vector<3x256xf32>
    %11 = vector.extract_strided_slice %2 {offsets = [0, 1], sizes = [3, 1], strides = [1, 1]} : vector<3x4xf32> to vector<3x1xf32>
    %12 = vector.extract_strided_slice %1 {offsets = [1, 0], sizes = [1, 256], strides = [1, 1]} : vector<4x256xf32> to vector<1x256xf32>
    %13 = vector.broadcast %11 : vector<3x1xf32> to vector<3x256xf32>
    %14 = vector.broadcast %12 : vector<1x256xf32> to vector<3x256xf32>
    %15 = arith.mulf %13, %14 : vector<3x256xf32>
    %16 = arith.addf %10, %15 : vector<3x256xf32>
    %17 = vector.extract_strided_slice %2 {offsets = [0, 2], sizes = [3, 1], strides = [1, 1]} : vector<3x4xf32> to vector<3x1xf32>
    %18 = vector.extract_strided_slice %1 {offsets = [2, 0], sizes = [1, 256], strides = [1, 1]} : vector<4x256xf32> to vector<1x256xf32>
    %19 = vector.broadcast %17 : vector<3x1xf32> to vector<3x256xf32>
    %20 = vector.broadcast %18 : vector<1x256xf32> to vector<3x256xf32>
    %21 = arith.mulf %19, %20 : vector<3x256xf32>
    %22 = arith.addf %16, %21 : vector<3x256xf32>
    %23 = vector.extract_strided_slice %2 {offsets = [0, 3], sizes = [3, 1], strides = [1, 1]} : vector<3x4xf32> to vector<3x1xf32>
    %24 = vector.extract_strided_slice %1 {offsets = [3, 0], sizes = [1, 256], strides = [1, 1]} : vector<4x256xf32> to vector<1x256xf32>
    %25 = vector.broadcast %23 : vector<3x1xf32> to vector<3x256xf32>
    %26 = vector.broadcast %24 : vector<1x256xf32> to vector<3x256xf32>
    %27 = arith.mulf %25, %26 : vector<3x256xf32>
    %28 = arith.addf %22, %27 : vector<3x256xf32>
    %c0_6 = arith.constant 0 : index
    %c0_7 = arith.constant 0 : index
    %c0_8 = arith.constant 0 : index
    %29 = vector.load %arg5[%c0_6, %c0_7, %c0_8] : memref<1x3x256xf32, #tpu.memory_space<vmem>>, vector<1x3x256xf32>
    %30 = vector.shape_cast %29 : vector<1x3x256xf32> to vector<3x256xf32>
    %31 = vector.shape_cast %28 : vector<3x256xf32> to vector<1x3x256xf32>
    tpu.vector_store %arg5[%c0_6, %c0_7, %c0_8], %31 {strides = array<i32>} : memref<1x3x256xf32, #tpu.memory_space<vmem>>, vector<1x3x256xf32>,
    return
  }
  func.func @transform_0(%arg0: i32, %arg1: i32) -> (i32, i32, i32) {
    %c0_i32 = arith.constant 0 : i32
    %c0_i32_0 = arith.constant 0 : i32
    return %arg0, %c0_i32, %arg1 : i32, i32, i32
  }
  func.func @transform_1(%arg0: i32, %arg1: i32) -> (i32, i32) {
    %c0_i32 = arith.constant 0 : i32
    %c0_i32_0 = arith.constant 0 : i32
    %c0_i32_1 = arith.constant 0 : i32
    return %c0_i32, %c0_i32_0 : i32, i32
  }
  func.func @transform_2(%arg0: i32, %arg1: i32) -> (i32, i32) {
    %c0_i32 = arith.constant 0 : i32
    %c0_i32_0 = arith.constant 0 : i32
    %c0_i32_1 = arith.constant 0 : i32
    return %c0_i32, %c0_i32_0 : i32, i32
  }
  func.func @transform_3(%arg0: i32, %arg1: i32) -> (i32, i32, i32) {
    %c0_i32 = arith.constant 0 : i32
    %c0_i32_0 = arith.constant 0 : i32
    return %arg0, %c0_i32, %arg1 : i32, i32, i32
  }
}

</mosaic_0001>

<bundles_post_ra>
// kernel: tpu_custom_call.1
= control target key start
LH: loop header
LB: loop body
LE: loop exit
PB: predicated region body
PF: predicated region fallthrough
CT: control target
= control target key end

     0   :  { %8 = vsyncpa [#allocation3], 0  ;;  %s720_s0 = inlined_call_operand.hbm [shape: f32[2,4,256], index: 0, kind: input, shape index: {}]   ;;  %s721_s1 = inlined_call_operand.vmem [shape: f32[3,4], index: 1, kind: input, shape index: {}]   ;;  %s722_s2 = inlined_call_operand.vmem [shape: f32[3,1], index: 2, kind: input, shape index: {}]   ;;  %s723_s3 = inlined_call_operand.vmem [shape: f32[2,3,256], index: 3, kind: output, shape index: {}]  }
   0x1   :  { %10 = vsyncpa [#allocation3 + $0x1], 0  ;;  %s614_s12 = smov 0   ;;  %s616_s13 = smov 0  }
   0x2   :  { %s618_s14 = smov 0   ;;  %s620_s15 = smov 0  }
   0x3   :  { %s622_s16 = smov 0   ;;  %s624_s17 = smov 0  }
   0x4 LB: > { %s431_s18 = sadd.s32 4294967295, %s587_s17   ;;  %s28_s19 = sadd.s32 1, %s583_s16  ;;  %s587_s17 = sphi %s624_s17, %s16_s17   ;;  %s583_s16 = sphi %s622_s16, %s731_s16   ;;  %s579_s15 = sphi %s620_s15, %s730_s15   ;;  %s575_s14 = sphi %s618_s14, %s729_s14   ;;  %s571_s13 = sphi %s616_s13, %s728_s13   ;;  %s567_s12 = sphi %s614_s12, %s727_s12  }
   0x5   : > { %p30_p0 = scmp.ge.s32.totalorder %s28_s19, 2  ;;  %s37_s20 = sadd.s32 1, %s575_s14 }
   0x6   : > { %p44_p1 = scmp.ne.s32.totalorder %s575_s14, %s571_s13  ;;  %p45_p2 = scmp.eq.s32.totalorder %s587_s17, 0 }
   0x7   : > { %s733_s19 = smov (%p30_p0, %s28_s19), 0  ;;  %p50_p4 = scmp.ne.s32.totalorder %s571_s13, %s567_s12 }
   0x8   : > { %p650_p3 = por %p45_p2, %p44_p1  ;;  %s32_s22 = ssub.s32 %s583_s16, %s733_s19 }
   0x9   : > { %p51_p5 = scmp.eq.s32.totalorder %s431_s18, 0  ;;  %p35_p6 = scmp.eq.s32.totalorder %s32_s22, 0 }
   0xa   : > { %p452_p8 = scmp.lt.s32.totalorder %s587_s17, 2  ;;  %s150_s25 = sand.u32 1, %s575_s14  }
   0xb   : > { %p657_p7 = por %p51_p5, %p50_p4  ;;  %s444_s26 = sshll.u32 %s583_s16, 7 }
   0xc   : > { %s663_s24 = scalar_select %p35_p6, %s575_s14, %s37_s20  }
   0xd   : > { %s435_s27 = sshll.u32 %s150_s25, 3  ;;  %s162_s30 = scalar_lea.hbm %s720_s0, %s444_s26 }
   0xe   : > { %s154_s4 = scalar_lea.vmem [#allocation2], %s435_s27  ;;  %p672_p9 = pnand %p452_p8, %p650_p3 }
   0xf   : > { %s164_s5 = sshll.u32 %s154_s4, 4  ;;  %p438_p10 = scmp.ge.s32.totalorder %s587_s17, 1  ;;  %s165_s5 = int_to_ptr.vmem [resolvable:$true] %s164_s5 }
  0x10   : > { %p169_p11 = scmp.lt.s32.totalorder %s587_s17, 3  ;;  %s151_s7 = scalar_lea.sflag [#allocation3], %s150_s25 }
  0x11   : > { %p511_p12 = pneg %p672_p9  ;;  %s522_s8 = scalar_lea.vmem %s165_s5, 128 }
  0x12   : > { %p523_p13 = scmp.ne.s32.totalorder %s165_s5, %s522_s8  ;;  %s589_s9 = smov [#allocation2]  }
  0x13   : > { %s527_s10 = sshll.u32 %s589_s9, 4  ;;  %s528_s10 = int_to_ptr.vmem [resolvable:$false] %s527_s10 }
  0x14   : > { %p525_p0 = pnand %p523_p13, %p511_p12  ;;  %s529_s11 = scalar_lea.vmem %s528_s10, 256 }
  0x15   : > { %p530_p2 = scmp.lt.s32.totalorder %s165_s5, %s528_s10  ;;  %p531_p3 = scmp.lt.s32.totalorder %s529_s11, %s522_s8 }
  0x16   : > { %p526_p1 = pneg %p525_p0 }
  0x17   : > { %p532_p4 = por %p531_p3, %p530_p2 }
  0x19   : > { %p533_p5 = pnand %p532_p4, %p526_p1 }
  0x1b   : > { %536 = shalt.err (!%p533_p5)
}
  0x1c   : > { %451 = dma.hbm_to_vmem [thread:$0]  (!%p672_p9), %s162_s30, 128, %s165_s5, %s151_s7  }
  0x1d   : > { %p170_p6 = pnand %p438_p10, %p169_p11 }
  0x1e   : > { %s175_s12 = sand.u32 (!%p170_p6), 1, %s571_s13  }
  0x1f   : > { %173 = sbr.rel (%p170_p6) target bundleno = 179 (0xb3), region = 32  ;;  %s439_s18 = sshll.u32 (!%p170_p6), %s175_s12, 3 }
  0x20   : > { %s176_s20 = scalar_lea.sflag (!%p170_p6), [#allocation3], %s175_s12  ;;  %s179_s21 = scalar_lea.vmem (!%p170_p6), [#allocation2], %s439_s18 }
  0x24   : > { %562 = dma.done.wait (%p657_p7), %s176_s20, 128  }
  0x25   : > { %564 = vsyncadd (%p657_p7), %s176_s20, 4294967168  ;;  %v590_v0 = vmov 0   ;;  %v591_v1 = vmov 1   ;;  %v218_v2 = vld [vmem:[%s721_s1] sm:$0x7]  ;;  %v592_v4 = vmov 2   ;;  %v226_v6 = vlaneseq }
  0x26   : > { %505 = vset.pattern.permute.xlu0 %v590_v0  ;;  %506 = vset.pattern.permute.xlu1 %v591_v1  ;;  %v219_v3 = vld [vmem:[%s722_s2] sm:$0x7]  ;;  %v593_v5 = vmov 3   ;;  %p208_p7 = scmp.lt.s32.totalorder %s579_s15, 1 }
  0x27   : > { %222 = vperm.xlu0 %505, %v218_v2   ;;  %254 = vperm.xlu1 %506, %v218_v2   ;;  %v227_v7 = vshrl.u32 %v226_v6, 7  ;;  %v217_v10 = vld [vmem:[%s179_s21] sm:$0xff] }
  0x28   : > { %s735_s15 = smov (!%p208_p7, %s579_s15), 1 }
  0x29   : > { %v228_v8 = vsub.s32 0, %v227_v7  ;;  %v232_v9 = vsub.s32 4, %v227_v7  ;;  %v259_v11 = vsub.s32 1, %v227_v7  ;;  %v263_v12 = vsub.s32 5, %v227_v7  ;;  %s445_s23 = sshll.u32 %s735_s15, 3 }
  0x2a   : > { %v285_v13 = vsub.s32 2, %v227_v7  ;;  %v289_v14 = vsub.s32 6, %v227_v7  ;;  %v311_v21 = vsub.s32 3, %v227_v7  ;;  %v315_v22 = vsub.s32 7, %v227_v7  ;;  %s215_s30 = scalar_lea.vmem %s723_s3, %s445_s23 }
  0x2b   : > { %248 = vperm.xlu0 %505, %v219_v3   ;;  %507 = vset.pattern.permute.xlu1 %v592_v4  ;;  %v229_v15 = vrot.slane %v217_v10, %v228_v8  ;;  %v233_v16 = vrot.slane %v217_v10, %v232_v9  ;;  %v260_v17 = vrot.slane %v217_v10, %v259_v11 }
  0x2c   : > { %280 = vperm.xlu1 %507, %v218_v2   ;;  %v264_v18 = vrot.slane %v217_v10, %v263_v12  ;;  %v286_v19 = vrot.slane %v217_v10, %v285_v13  ;;  %v290_v20 = vrot.slane %v217_v10, %v289_v14  ;;  %v312_v31 = vrot.slane %v217_v10, %v311_v21 }
  0x2d   : > { %v239_v23 = vrot.slane %v229_v15, %v228_v8  ;;  %v243_v24 = vrot.slane %v233_v16, %v228_v8  ;;  %v270_v27 = vrot.slane %v260_v17, %v259_v11  ;;  %v316_v32 = vrot.slane %v217_v10, %v315_v22 }
  0x2e   : > { %v274_v28 = vrot.slane %v264_v18, %v259_v11  ;;  %v296_v29 = vrot.slane %v286_v19, %v285_v13  ;;  %v300_v30 = vrot.slane %v290_v20, %v285_v13  ;;  %v322_v43 = vrot.slane %v312_v31, %v311_v21 }
  0x2f   : > { %508 = vset.pattern.permute.xlu0 %v593_v5  ;;  %v326_v44 = vrot.slane %v316_v32, %v311_v21 }
  0x30   : > { %306 = vperm.xlu0 %508, %v218_v2  }
  0xa2   : > { %v223_v25 = vpop.permute.xlu0 %222  ;;  %v255_v26 = vpop.permute.xlu1 %254 }
  0xa3   : > { %v244_v33 = vmul.f32 %v239_v23, %v223_v25  ;;  %v245_v34 = vmul.f32 %v243_v24, %v223_v25  ;;  %v275_v36 = vmul.f32 %v270_v27, %v255_v26  ;;  %v276_v37 = vmul.f32 %v274_v28, %v255_v26 }
  0xa6   : > { %v249_v35 = vpop.permute.xlu0 %248 }
  0xa7   : > { %v251_v38 = vadd.f32 %v249_v35, %v244_v33  ;;  %v252_v39 = vadd.f32 %v249_v35, %v245_v34  ;;  %v281_v40 = vpop.permute.xlu1 %280 }
  0xa8   : > { %v301_v41 = vmul.f32 %v296_v29, %v281_v40  ;;  %v302_v42 = vmul.f32 %v300_v30, %v281_v40 }
  0xa9   : > { %v277_v45 = vadd.f32 %v275_v36, %v251_v38  ;;  %v278_v46 = vadd.f32 %v276_v37, %v252_v39 }
  0xab   : > { %v303_v47 = vadd.f32 %v301_v41, %v277_v45  ;;  %v304_v48 = vadd.f32 %v302_v42, %v278_v46  ;;  %v307_v49 = vpop.permute.xlu0 %306 }
  0xac   : > { %v327_v50 = vmul.f32 %v322_v43, %v307_v49  ;;  %v328_v51 = vmul.f32 %v326_v44, %v307_v49 }
  0xae   : > { %v329_v52 = vadd.f32 %v327_v50, %v303_v47  ;;  %v330_v53 = vadd.f32 %v328_v51, %v304_v48 }
  0xb0   : > { %v333_v54 = vcombine.low %v329_v52, %v330_v53 }
  0xb2   : > { %335 = vst [vmem:[%s215_s30] sm:$0x77] %v333_v54 }
  0xb3 PF: > { %s16_s17 = sadd.s32 1, %s587_s17   ;;  %s727_s12 = smov %s571_s13 }
  0xb4   : > { %p13_p8 = scmp.ge.s32.totalorder %s16_s17, 4   ;;  %s728_s13 = smov %s575_s14 }
  0xb5   : > { %s729_s14 = smov %s663_s24  ;;  %s730_s15 = smov %s583_s16 }
  0xb6   : > { %s731_s16 = smov %s733_s19  ;;  %15 = sbr.rel (!%p13_p8) target bundleno = 4 (0x4), region = 72 }
  0xbb   :  { %366 = vsyncpa [#allocation3], 1 }
  0xbc   :  { %368 = vsyncpa [#allocation3 + $0x1], 1 }

</bundles_post_ra>
